<compile_context>
chip_gen: v7x
topology: tpu7x:2x2x1
jax: 0.10.0
libtpu: 0.0.40
codegen_flags: <defaults>
</compile_context>

<pallas_src>
import functools

import jax
import jax.numpy as jnp
from jax import lax
from jax.experimental import pallas as pl
from jax.experimental.pallas import tpu as pltpu

EPS = 1e-5  # nn.BatchNorm2d default eps


def _smbn_kernel(x_ref, gamma_ref, beta_ref, out_ref, *, inv_count):
    # x: (N, Ct, HWp) f32 — one channel block, all samples, full (padded) spatial.
    x = x_ref[...]

    # ---- Per-channel batch statistics (single pass: sum / sum-of-squares).
    # Padded spatial zeros contribute 0 to both sums; inv_count = 1 / (N*H*W)
    # uses the *true* element count, so stats are exact.
    s = jnp.sum(x, axis=(0, 2), keepdims=True)        # (1, Ct, 1)
    sq = jnp.sum(x * x, axis=(0, 2), keepdims=True)   # (1, Ct, 1)
    mean = s * inv_count
    var = sq * inv_count - mean * mean                # biased variance
    inv_std = lax.rsqrt(var + EPS)                    # (1, Ct, 1)

    # ---- Fold modulation + normalization into one per-element FMA.
    scale = (gamma_ref[...] + 1.0) * inv_std          # (N, Ct, 1)
    shift = beta_ref[...] - mean * scale              # (N, Ct, 1)
    out_ref[...] = x * scale + shift


def _pick_channel_tile(N, C, HWp, budget_bytes=24 * 1024 * 1024):
    """Largest channel tile (multiple of 8 dividing C, or C itself) whose
    double-buffered in+out working set fits the per-step VMEM budget."""
    def step_bytes(ct):
        return 2 * 2 * N * ct * HWp * 4  # (x block + out block) * 2 buffers, f32

    cands = [ct for ct in range(8, C, 8) if C % ct == 0] + [C]
    fitting = [ct for ct in cands if step_bytes(ct) <= budget_bytes]
    return max(fitting) if fitting else min(cands)


def self_modulate_batchnorm2d(x_nchw, style, params):
    """x_nchw: (N, C, H, W) f32;  style: (N, S) f32;  params: dict of weights."""
    N, C, H, W = x_nchw.shape
    HW = H * W
    HWp = pl.cdiv(HW, 128) * 128  # lane-dense blocks

    # ---- Style MLPs (tiny; run as plain XLA matmuls, not in the kernel). ----
    def mlp(w1, b1, w2, b2):
        h = style @ w1 + b1
        h = h * jax.nn.sigmoid(h)                     # Swish
        return h @ w2 + b2

    beta = mlp(params["wb1"], params["bb1"], params["wb2"], params["bb2"])
    gamma = mlp(params["wg1"], params["bg1"], params["wg2"], params["bg2"])
    gamma3 = gamma.astype(jnp.float32)[:, :, None]    # (N, C, 1)
    beta3 = beta.astype(jnp.float32)[:, :, None]      # (N, C, 1)

    # ---- Prepare the big tensor: (N, C, HW) with HW padded to 128. ----
    x3 = x_nchw.reshape(N, C, HW).astype(jnp.float32)
    if HWp != HW:
        x3 = jnp.pad(x3, ((0, 0), (0, 0), (0, HWp - HW)))

    Ct = _pick_channel_tile(N, C, HWp)
    grid = (C // Ct,)

    kernel = functools.partial(_smbn_kernel, inv_count=1.0 / float(N * HW))

    out3 = pl.pallas_call(
        kernel,
        out_shape=jax.ShapeDtypeStruct((N, C, HWp), jnp.float32),
        grid=grid,
        in_specs=[
            pl.BlockSpec((N, Ct, HWp), lambda c: (0, c, 0)),   # x
            pl.BlockSpec((N, Ct, 1), lambda c: (0, c, 0)),     # gamma
            pl.BlockSpec((N, Ct, 1), lambda c: (0, c, 0)),     # beta
        ],
        out_specs=pl.BlockSpec((N, Ct, HWp), lambda c: (0, c, 0)),
        compiler_params=pltpu.CompilerParams(
            dimension_semantics=("parallel",),       # channel blocks independent
            vmem_limit_bytes=48 * 1024 * 1024,
        ),
    )(x3, gamma3, beta3)

    if HWp != HW:
        out3 = out3[:, :, :HW]
    return out3.reshape(N, C, H, W)


def init_params(key, in_channel, style_dim):
    """Deterministic synthetic parameters (PyTorch Linear stores W as (out,in);
    we keep the transposed (in,out) layout so the wrapper does s @ W + b)."""
    ks = jax.random.split(key, 8)
    scale1 = 1.0 / jnp.sqrt(style_dim)
    scale2 = 1.0 / jnp.sqrt(in_channel)
    return {
        "wb1": jax.random.uniform(ks[0], (style_dim, in_channel), jnp.float32, -scale1, scale1),
        "bb1": jax.random.uniform(ks[1], (1, in_channel), jnp.float32, -scale1, scale1),
        "wb2": jax.random.uniform(ks[2], (in_channel, in_channel), jnp.float32, -scale2, scale2),
        "bb2": jax.random.uniform(ks[3], (1, in_channel), jnp.float32, -scale2, scale2),
        "wg1": jax.random.uniform(ks[4], (style_dim, in_channel), jnp.float32, -scale1, scale1),
        "bg1": jax.random.uniform(ks[5], (1, in_channel), jnp.float32, -scale1, scale1),
        "wg2": jax.random.uniform(ks[6], (in_channel, in_channel), jnp.float32, -scale2, scale2),
        "bg2": jax.random.uniform(ks[7], (1, in_channel), jnp.float32, -scale2, scale2),
    }


def reference(x, style, p):
    """Pure-JAX reference mirroring the PyTorch forward."""
    mean = jnp.mean(x, axis=(0, 2, 3), keepdims=True)
    var = jnp.mean((x - mean) ** 2, axis=(0, 2, 3), keepdims=True)
    x_hat = (x - mean) / jnp.sqrt(var + EPS)

    def mlp(w1, b1, w2, b2):
        h = style @ w1 + b1
        h = h * jax.nn.sigmoid(h)
        return h @ w2 + b2

    beta = mlp(p["wb1"], p["bb1"], p["wb2"], p["bb2"])[:, :, None, None]
    gamma = mlp(p["wg1"], p["bg1"], p["wg2"], p["bg2"])[:, :, None, None]
    return x_hat * (gamma + 1.0) + beta


if __name__ == "__main__":
    N, C, H, W, S = 2, 4, 16, 16, 8
    key = jax.random.PRNGKey(0)
    kx, ks, kp = jax.random.split(key, 3)

    x = jax.random.normal(kx, (N, C, H, W), jnp.float32)
    style = jax.random.normal(ks, (N, S), jnp.float32)
    params = init_params(kp, C, S)

    out = self_modulate_batchnorm2d(x, style, params)
    out = jax.block_until_ready(out)

    ref = reference(x, style, params)
    assert out.shape == (N, C, H, W)
    assert jnp.allclose(out, ref, atol=1e-4, rtol=1e-4), "mismatch vs reference"

    print("KERNEL_OK")
</pallas_src>

<mosaic_0001>
module attributes {stable_mosaic.version = 11 : i64} {
  func.func @_smbn_kernel(%arg0: i32, %arg1: memref<2x4x256xf32, #tpu.memory_space<vmem>>, %arg2: memref<2x4x1xf32, #tpu.memory_space<vmem>>, %arg3: memref<2x4x1xf32, #tpu.memory_space<vmem>>, %arg4: memref<2x4x256xf32, #tpu.memory_space<vmem>>) attributes {dimension_semantics = [#tpu.dimension_semantics<parallel>], iteration_bounds = array<i64: 1>, scalar_prefetch = 0 : i64, scratch_operands = 0 : i64, tpu.core_type = #tpu.core_type<tc>, window_params = [{transform_indices = @transform_0, window_bounds = array<i64: 2, 4, 256>}, {transform_indices = @transform_1, window_bounds = array<i64: 2, 4, 1>}, {transform_indices = @transform_2, window_bounds = array<i64: 2, 4, 1>}, {transform_indices = @transform_3, window_bounds = array<i64: 2, 4, 256>}]} {
    %c0 = arith.constant 0 : index
    %c0_0 = arith.constant 0 : index
    %c0_1 = arith.constant 0 : index
    %0 = vector.load %arg1[%c0, %c0_0, %c0_1] : memref<2x4x256xf32, #tpu.memory_space<vmem>>, vector<2x4x256xf32>
    %cst = arith.constant dense<0.000000e+00> : vector<4xf32>
    %1 = vector.multi_reduction <add>, %0, %cst [0, 2] : vector<2x4x256xf32> to vector<4xf32>
    %2 = vector.shape_cast %1 : vector<4xf32> to vector<1x4x1xf32>
    %3 = arith.mulf %0, %0 : vector<2x4x256xf32>
    %cst_2 = arith.constant dense<0.000000e+00> : vector<4xf32>
    %4 = vector.multi_reduction <add>, %3, %cst_2 [0, 2] : vector<2x4x256xf32> to vector<4xf32>
    %5 = vector.shape_cast %4 : vector<4xf32> to vector<1x4x1xf32>
    %cst_3 = arith.constant 0.001953125 : f32
    %6 = vector.broadcast %cst_3 : f32 to vector<1x4x1xf32>
    %7 = arith.mulf %2, %6 : vector<1x4x1xf32>
    %cst_4 = arith.constant 0.001953125 : f32
    %8 = vector.broadcast %cst_4 : f32 to vector<1x4x1xf32>
    %9 = arith.mulf %5, %8 : vector<1x4x1xf32>
    %10 = arith.mulf %7, %7 : vector<1x4x1xf32>
    %11 = arith.subf %9, %10 : vector<1x4x1xf32>
    %cst_5 = arith.constant 9.99999974E-6 : f32
    %12 = vector.broadcast %cst_5 : f32 to vector<1x4x1xf32>
    %13 = arith.addf %11, %12 : vector<1x4x1xf32>
    %14 = math.rsqrt %13 : vector<1x4x1xf32>
    %c0_6 = arith.constant 0 : index
    %c0_7 = arith.constant 0 : index
    %c0_8 = arith.constant 0 : index
    %15 = vector.load %arg2[%c0_6, %c0_7, %c0_8] : memref<2x4x1xf32, #tpu.memory_space<vmem>>, vector<2x4x1xf32>
    %cst_9 = arith.constant 1.000000e+00 : f32
    %16 = vector.broadcast %cst_9 : f32 to vector<2x4x1xf32>
    %17 = arith.addf %15, %16 : vector<2x4x1xf32>
    %18 = vector.broadcast %14 : vector<1x4x1xf32> to vector<2x4x1xf32>
    %19 = arith.mulf %17, %18 : vector<2x4x1xf32>
    %c0_10 = arith.constant 0 : index
    %c0_11 = arith.constant 0 : index
    %c0_12 = arith.constant 0 : index
    %20 = vector.load %arg3[%c0_10, %c0_11, %c0_12] : memref<2x4x1xf32, #tpu.memory_space<vmem>>, vector<2x4x1xf32>
    %21 = vector.broadcast %7 : vector<1x4x1xf32> to vector<2x4x1xf32>
    %22 = arith.mulf %21, %19 : vector<2x4x1xf32>
    %23 = arith.subf %20, %22 : vector<2x4x1xf32>
    %24 = vector.broadcast %19 : vector<2x4x1xf32> to vector<2x4x256xf32>
    %25 = arith.mulf %0, %24 : vector<2x4x256xf32>
    %26 = vector.broadcast %23 : vector<2x4x1xf32> to vector<2x4x256xf32>
    %27 = arith.addf %25, %26 : vector<2x4x256xf32>
    %c0_13 = arith.constant 0 : index
    %c0_14 = arith.constant 0 : index
    %c0_15 = arith.constant 0 : index
    %28 = vector.load %arg4[%c0_13, %c0_14, %c0_15] : memref<2x4x256xf32, #tpu.memory_space<vmem>>, vector<2x4x256xf32>
    tpu.vector_store %arg4[%c0_13, %c0_14, %c0_15], %27 {strides = array<i32>} : memref<2x4x256xf32, #tpu.memory_space<vmem>>, vector<2x4x256xf32>,
    return
  }
  func.func @transform_0(%arg0: i32) -> (i32, i32, i32) {
    %c0_i32 = arith.constant 0 : i32
    %c0_i32_0 = arith.constant 0 : i32
    %c0_i32_1 = arith.constant 0 : i32
    return %c0_i32, %arg0, %c0_i32_0 : i32, i32, i32
  }
  func.func @transform_1(%arg0: i32) -> (i32, i32, i32) {
    %c0_i32 = arith.constant 0 : i32
    %c0_i32_0 = arith.constant 0 : i32
    %c0_i32_1 = arith.constant 0 : i32
    return %c0_i32, %arg0, %c0_i32_0 : i32, i32, i32
  }
  func.func @transform_2(%arg0: i32) -> (i32, i32, i32) {
    %c0_i32 = arith.constant 0 : i32
    %c0_i32_0 = arith.constant 0 : i32
    %c0_i32_1 = arith.constant 0 : i32
    return %c0_i32, %arg0, %c0_i32_0 : i32, i32, i32
  }
  func.func @transform_3(%arg0: i32) -> (i32, i32, i32) {
    %c0_i32 = arith.constant 0 : i32
    %c0_i32_0 = arith.constant 0 : i32
    %c0_i32_1 = arith.constant 0 : i32
    return %c0_i32, %arg0, %c0_i32_0 : i32, i32, i32
  }
}

</mosaic_0001>

<bundles_post_ra>
// kernel: tpu_custom_call.1
= control target key start
LH: loop header
LB: loop body
LE: loop exit
PB: predicated region body
PF: predicated region fallthrough
CT: control target
= control target key end

     0   :  { %vm23_vm0 = vcmask 1043456   ;;  %s252_s0 = inlined_call_operand.vmem [shape: f32[2,4,256], index: 0, kind: input, shape index: {}]   ;;  %s253_s1 = inlined_call_operand.vmem [shape: f32[2,4,1], index: 1, kind: input, shape index: {}]   ;;  %s254_s2 = inlined_call_operand.vmem [shape: f32[2,4,1], index: 2, kind: input, shape index: {}]   ;;  %s255_s3 = inlined_call_operand.hbm [shape: f32[2,4,256], index: 3, kind: output, shape index: {}]  }
   0x1   :  { %v201_v0 = vld [vmem:[%s252_s0] sm:$0xff]  ;;  %v206_v1 = vld [vmem:[%s252_s0 + $0x8] sm:$0xff] }
   0x2   :  { %8 = vsyncpa [#allocation3], 0  ;;  %v19_v2 = vcombine.high %v201_v0, %v201_v0  ;;  %v20_v3 = vcombine.high %v206_v1, %v206_v1  ;;  %v24_v4 = vsel %vm23_vm0, %v201_v0, 0.0  ;;  %v33_v5 = vmul.f32 %v201_v0, %v201_v0  ;;  %v56_v30 = vld [vmem:[%s253_s1] sm:$0xf] }
   0x3   :  { %v34_v6 = vmul.f32 %v206_v1, %v206_v1  ;;  %v27_v8 = vsel %vm23_vm0, %v206_v1, 0.0  ;;  %v173_v22 = vmov 0   ;;  %v57_v31 = vld [vmem:[%s253_s1 + $0x4] sm:$0xf]  ;;  %v58_v32 = vadd.f32 1.0, %v56_v30  ;;  %s175_s1 = smov [#allocation2]  }
   0x4   :  { %v25_v7 = vsel %vm23_vm0, %v19_v2, 0.0  ;;  %v37_v10 = vcombine.high %v33_v5, %v33_v5  ;;  %v41_v12 = vsel %vm23_vm0, %v33_v5, 0.0  ;;  %v29_v13 = vsel %vm23_vm0, %v20_v3, 0.0  ;;  %143 = vset.pattern.permute.xlu1 %v173_v22  ;;  %144 = vset.pattern.permute.xlu0 %v173_v22  ;;  %v62_v37 = vld [vmem:[%s254_s2] sm:$0xf] }
   0x5   :  { %v26_v9 = vadd.f32 %v25_v7, %v24_v4  ;;  %v38_v11 = vcombine.high %v34_v6, %v34_v6  ;;  %v44_v16 = vsel %vm23_vm0, %v34_v6, 0.0  ;;  %v59_v33 = vadd.f32 1.0, %v57_v31  ;;  %v63_v41 = vld [vmem:[%s254_s2 + $0x4] sm:$0xf]  ;;  %s127_s2 = sshll.u32 %s175_s1, 4  ;;  %s128_s2 = int_to_ptr.vmem [resolvable:$true] %s127_s2 }
   0x6   :  { %v42_v15 = vsel %vm23_vm0, %v37_v10, 0.0  ;;  %v174_v43 = vmov 839922192   ;;  %v79_v45 = vlaneseq  ;;  %s149_s23 = scalar_lea.vmem %s128_s2, 256  ;;  %p154_p1 = scmp.lt.s32.totalorder %s128_s2, %s128_s2 }
   0x7   :  { %v28_v14 = vadd.f32 %v27_v8, %v26_v9  ;;  %v43_v17 = vadd.f32 %v42_v15, %v41_v12  ;;  %v46_v19 = vsel %vm23_vm0, %v38_v11, 0.0  ;;  %v77_v44 = vunpack.c.l.s4 %v174_v43  ;;  %p150_p0 = scmp.ne.s32.totalorder %s128_s2, %s149_s23  ;;  %p155_p2 = scmp.lt.s32.totalorder %s149_s23, %s149_s23 }
   0x8   :  { %v80_v47 = vshrl.u32 %v79_v45, 7 }
   0x9   :  { %v30_v18 = vadd.f32 %v29_v13, %v28_v14  ;;  %v45_v20 = vadd.f32 %v44_v16, %v43_v17  ;;  %v78_v46 = vunpack.c.0.s8 %v77_v44  ;;  %p156_p3 = por %p155_p2, %p154_p1 }
   0xb   :  { %31 = vadd.xlane.f32.xlu0 %v30_v18  ;;  %v47_v21 = vadd.f32 %v46_v19, %v45_v20  ;;  %v81_v48 = vsub.s32 %v78_v46, %v80_v47  ;;  %p157_p4 = pnand %p156_p3, %p150_p0 }
   0xf   :  { %48 = vadd.xlane.f32.xlu0 %v47_v21 }
  0x98   :  { %v32_v23 = vpop.xlane.xlu0 %31 }
  0x99   :  { %v50_v24 = vmul.f32 0.001953125, %v32_v23 }
  0x9b   :  { %v52_v26 = vmul.f32 %v50_v24, %v50_v24 }
  0x9c   :  { %v49_v25 = vpop.xlane.xlu0 %48 }
  0x9d   :  { %v51_v27 = vmul.f32 0.001953125, %v49_v25 }
  0x9f   :  { %v53_v28 = vsub.f32 %v51_v27, %v52_v26 }
  0xa1   :  { %v54_v29 = vadd.f32 1e-05, %v53_v28 }
  0xa3   :  { %147 = vrsqrt.f32 %v54_v29 }
  0xad   :  { %v148_v34 = vpop.eup %147 }
  0xae   :  { %v60_v35 = vmul.f32 %v148_v34, %v58_v32  ;;  %v61_v36 = vmul.f32 %v148_v34, %v59_v33 }
  0xb0   :  { %70 = vperm.xlu1 %143, %v60_v35   ;;  %v64_v38 = vmul.f32 %v60_v35, %v50_v24  ;;  %v65_v40 = vmul.f32 %v61_v36, %v50_v24 }
  0xb2   :  { %v66_v39 = vsub.f32 %v62_v37, %v64_v38  ;;  %v67_v42 = vsub.f32 %v63_v41, %v65_v40 }
  0xb4   :  { %74 = vperm.xlu1 %143, %v61_v36   ;;  %96 = vperm.xlu0 %144, %v66_v39  }
  0xb8   :  { %100 = vperm.xlu1 %143, %v67_v42  }
 0x12f   :  { %v71_v49 = vpop.permute.xlu1 %70 }
 0x130   :  { %v82_v50 = vrot.slane %v71_v49, %v81_v48 }
 0x132   :  { %v92_v53 = vmul.f32 %v82_v50, %v201_v0 }
 0x133   :  { %v75_v51 = vpop.permute.xlu1 %74  ;;  %v97_v52 = vpop.permute.xlu0 %96 }
 0x134   :  { %v89_v54 = vrot.slane %v75_v51, %v81_v48  ;;  %v108_v55 = vrot.slane %v97_v52, %v81_v48 }
 0x136   :  { %v118_v56 = vadd.f32 %v108_v55, %v92_v53  ;;  %v93_v58 = vmul.f32 %v89_v54, %v206_v1 }
 0x137   :  { %v101_v57 = vpop.permute.xlu1 %100 }
 0x138   :  { %120 = vst [vmem:[#allocation2] sm:$0xff] %v118_v56  ;;  %v115_v59 = vrot.slane %v101_v57, %v81_v48 }
 0x13a   :  { %v119_v60 = vadd.f32 %v115_v59, %v93_v58 }
 0x13c   :  { %121 = vst [vmem:[#allocation2 + $0x8] sm:$0xff] %v119_v60 }
 0x13d   :  { %160 = shalt.err (!%p157_p4)
}
 0x13e   :  { %s161_s26 = scalar_lea.hbm %s255_s3, 256 }
 0x13f   :  { %p162_p5 = scmp.ne.s32.totalorder %s255_s3, %s161_s26  ;;  %p165_p6 = scmp.lt.u32.totalorder %s161_s26, %s255_s3 }
 0x141   :  { %p167_p7 = pnand %p165_p6, %p162_p5 }
 0x143   :  { %170 = shalt.err (!%p167_p7)
}
 0x144   :  { %s176_s4 = smov 128   ;;  %s177_s5 = smov 8  }
 0x145   :  { %133 = dma.vmem_to_hbm [thread:$0]  %s128_s2, 256, %s255_s3, [#allocation3], %s176_s4, %s176_s4, %s177_s5  }
 0x146   :  { %171 = dma.done.wait [#allocation3], 256  }
 0x147   :  { %172 = vsyncadd [#allocation3], 4294967040 }
 0x148   :  { %137 = vsyncpa [#allocation3], 1 }

</bundles_post_ra>
